<compile_context>
chip_gen: v5e
topology: v5e:2x2
jax: 0.10.0
libtpu: 0.0.40
codegen_flags: <defaults>
</compile_context>

<pallas_src>
import math
import functools

import jax
import jax.numpy as jnp
from jax import lax
from jax.experimental import pallas as pl
from jax.experimental.pallas import tpu as pltpu


_LN_EPS = 1e-5
_VMEM_LIMIT = 48 * 1024 * 1024   # explicit scoped-VMEM budget; fits v5e/v6e/v7x


# ------------------------------ tile helpers -------------------------------

def _round_up(x, m):
    return (x + m - 1) // m * m


def _row_tile(m, max_tile=512):
    """Full M when small, else a 512-class row tile (rows get zero-padded)."""
    return m if m <= max_tile else max_tile


def _lane_tile(n, max_tile=512):
    """Largest lane tile <= max_tile dividing n; prefer multiples of 256 (MXU)."""
    if n <= max_tile:
        return n
    for step in (256, 128):
        start = max_tile - max_tile % step
        for t in range(start, step - 1, -step):
            if n % t == 0:
                return t
    return n


def _pad_rows(x2d, tm):
    m = x2d.shape[0]
    pad = _round_up(m, tm) - m
    if pad:
        x2d = jnp.pad(x2d, ((0, pad), (0, 0)))
    return x2d


# ----------------------------- Pallas kernels ------------------------------

def _linear_kernel(x_ref, w_ref, b_ref, o_ref, *, activation):
    x = x_ref[...].astype(jnp.bfloat16)          # no-op if already bf16
    y = jnp.dot(x, w_ref[...], preferred_element_type=jnp.float32) + b_ref[...]
    if activation == "relu":
        y = jnp.maximum(y, 0.0)
    o_ref[...] = y.astype(o_ref.dtype)


def linear(x2d, w, b, activation=None, out_dtype=jnp.float32):
    """y = x2d @ w + b.  Tiled over rows (M, padded) and output columns (N)."""
    M, K = x2d.shape
    N = w.shape[1]
    TM = _row_tile(M)
    TN = _lane_tile(N)
    xp = _pad_rows(x2d, TM)
    Mp = xp.shape[0]
    kern = functools.partial(_linear_kernel, activation=activation)
    out = pl.pallas_call(
        kern,
        out_shape=jax.ShapeDtypeStruct((Mp, N), out_dtype),
        grid=(Mp // TM, N // TN),
        in_specs=[
            pl.BlockSpec((TM, K), lambda i, j: (i, 0)),
            pl.BlockSpec((K, TN), lambda i, j: (0, j)),
            pl.BlockSpec((1, TN), lambda i, j: (0, j)),
        ],
        out_specs=pl.BlockSpec((TM, TN), lambda i, j: (i, j)),
        compiler_params=pltpu.CompilerParams(
            dimension_semantics=("parallel", "parallel"),
            vmem_limit_bytes=_VMEM_LIMIT),
    )(xp, w, b.reshape(1, N))
    return out[:M] if Mp != M else out


def _linear_res_ln_kernel(x_ref, res_ref, w_ref, b_ref, g_ref, bt_ref, o_ref, *, eps):
    x = x_ref[...].astype(jnp.bfloat16)
    y = jnp.dot(x, w_ref[...], preferred_element_type=jnp.float32) + b_ref[...]
    y = y + res_ref[...].astype(jnp.float32)
    mean = jnp.mean(y, axis=-1, keepdims=True)
    c = y - mean
    var = jnp.mean(c * c, axis=-1, keepdims=True)
    yn = c * lax.rsqrt(var + eps)
    o_ref[...] = (yn * g_ref[...] + bt_ref[...]).astype(o_ref.dtype)


def linear_residual_ln(x2d, res2d, w, b, gamma, beta, eps=_LN_EPS):
    """LayerNorm(residual + x2d @ w + b), fused in one kernel."""
    M, K = x2d.shape
    N = w.shape[1]
    TM = _row_tile(M)
    xp = _pad_rows(x2d, TM)
    rp = _pad_rows(res2d, TM)
    Mp = xp.shape[0]
    kern = functools.partial(_linear_res_ln_kernel, eps=eps)
    out = pl.pallas_call(
        kern,
        out_shape=jax.ShapeDtypeStruct((Mp, N), jnp.float32),
        grid=(Mp // TM,),
        in_specs=[
            pl.BlockSpec((TM, K), lambda i: (i, 0)),
            pl.BlockSpec((TM, N), lambda i: (i, 0)),
            pl.BlockSpec((K, N), lambda i: (0, 0)),
            pl.BlockSpec((1, N), lambda i: (0, 0)),
            pl.BlockSpec((1, N), lambda i: (0, 0)),
            pl.BlockSpec((1, N), lambda i: (0, 0)),
        ],
        out_specs=pl.BlockSpec((TM, N), lambda i: (i, 0)),
        compiler_params=pltpu.CompilerParams(
            dimension_semantics=("parallel",),
            vmem_limit_bytes=_VMEM_LIMIT),
    )(xp, rp, w, b.reshape(1, N), gamma.reshape(1, N), beta.reshape(1, N))
    return out[:M] if Mp != M else out


def _ffn_ln_kernel(x_ref, w1_ref, b1_ref, w2_ref, b2_ref, g_ref, bt_ref, o_ref,
                   acc_ref, *, eps):
    k = pl.program_id(1)
    nk = pl.num_programs(1)

    @pl.when(k == 0)
    def _():
        acc_ref[...] = jnp.zeros_like(acc_ref)

    x = x_ref[...].astype(jnp.bfloat16)
    h = jnp.dot(x, w1_ref[...], preferred_element_type=jnp.float32) + b1_ref[...]
    h = jnp.maximum(h, 0.0)
    acc_ref[...] += jnp.dot(h.astype(jnp.bfloat16), w2_ref[...],
                            preferred_element_type=jnp.float32)

    @pl.when(k == nk - 1)
    def _():
        y = acc_ref[...] + b2_ref[...] + x_ref[...].astype(jnp.float32)
        mean = jnp.mean(y, axis=-1, keepdims=True)
        c = y - mean
        var = jnp.mean(c * c, axis=-1, keepdims=True)
        yn = c * lax.rsqrt(var + eps)
        o_ref[...] = (yn * g_ref[...] + bt_ref[...]).astype(o_ref.dtype)


def ffn_residual_ln(x2d, w1, b1, w2, b2, gamma, beta, eps=_LN_EPS):
    """LayerNorm(x + relu(x@w1+b1)@w2 + b2) fused; hidden never hits HBM."""
    M, D = x2d.shape
    F = w1.shape[1]
    TM = _row_tile(M)
    TF = _lane_tile(F, max_tile=1024)   # bf16 weight blocks keep this in budget
    xp = _pad_rows(x2d, TM)
    Mp = xp.shape[0]
    kern = functools.partial(_ffn_ln_kernel, eps=eps)
    out = pl.pallas_call(
        kern,
        out_shape=jax.ShapeDtypeStruct((Mp, D), jnp.float32),
        grid=(Mp // TM, F // TF),
        in_specs=[
            pl.BlockSpec((TM, D), lambda i, k: (i, 0)),
            pl.BlockSpec((D, TF), lambda i, k: (0, k)),
            pl.BlockSpec((1, TF), lambda i, k: (0, k)),
            pl.BlockSpec((TF, D), lambda i, k: (k, 0)),
            pl.BlockSpec((1, D), lambda i, k: (0, 0)),
            pl.BlockSpec((1, D), lambda i, k: (0, 0)),
            pl.BlockSpec((1, D), lambda i, k: (0, 0)),
        ],
        out_specs=pl.BlockSpec((TM, D), lambda i, k: (i, 0)),
        scratch_shapes=[pltpu.VMEM((TM, D), jnp.float32)],
        compiler_params=pltpu.CompilerParams(
            dimension_semantics=("parallel", "arbitrary"),
            vmem_limit_bytes=_VMEM_LIMIT),
    )(xp, w1, b1.reshape(1, F), w2, b2.reshape(1, D),
      gamma.reshape(1, D), beta.reshape(1, D))
    return out[:M] if Mp != M else out


def _attn_heads(q_all, k_all, v_all, o_ref, *, num_heads, dh, scale, causal):
    """Per-head softmax(QK^T)V on lane-dense [S, D] values; one [S, D] store."""
    Sq = q_all.shape[0]
    Sk = k_all.shape[0]
    if causal:
        row = lax.broadcasted_iota(jnp.int32, (Sq, Sk), 0)
        col = lax.broadcasted_iota(jnp.int32, (Sq, Sk), 1)
        mask = col <= row
    outs = []
    for h in range(num_heads):
        lo = h * dh
        q = q_all[:, lo:lo + dh]
        k = k_all[:, lo:lo + dh]
        v = v_all[:, lo:lo + dh]
        # contract last dims directly (no explicit k.T transpose)
        s = lax.dot_general(q, k, (((1,), (1,)), ((), ())),
                            preferred_element_type=jnp.float32) * scale
        if causal:
            s = jnp.where(mask, s, -1e9)
        s = s - jnp.max(s, axis=-1, keepdims=True)
        p = jnp.exp(s)
        p = p * pl.reciprocal(jnp.sum(p, axis=-1, keepdims=True), approx=True)
        outs.append(jnp.dot(p.astype(jnp.bfloat16), v,
                            preferred_element_type=jnp.float32))
    # single lane-dense [Sq, D] store (unmasked vst) instead of per-head slices
    o_ref[0] = jnp.concatenate(outs, axis=-1).astype(o_ref.dtype)


def _self_attn_kernel(qkv_ref, o_ref, *, num_heads, dh, scale, causal):
    D = num_heads * dh
    qkv = qkv_ref[0]                                   # [S, 3D] bf16
    _attn_heads(qkv[:, :D], qkv[:, D:2 * D], qkv[:, 2 * D:3 * D], o_ref,
                num_heads=num_heads, dh=dh, scale=scale, causal=causal)


def self_attention(qkv, num_heads, causal):
    """qkv: [B, S, 3D] (fused projection, bf16) -> [B, S, D] bf16."""
    B, S, D3 = qkv.shape
    D = D3 // 3
    dh = D // num_heads
    kern = functools.partial(_self_attn_kernel, num_heads=num_heads, dh=dh,
                             scale=1.0 / math.sqrt(dh), causal=causal)
    return pl.pallas_call(
        kern,
        out_shape=jax.ShapeDtypeStruct((B, S, D), jnp.bfloat16),
        grid=(B,),
        in_specs=[pl.BlockSpec((1, S, D3), lambda b: (b, 0, 0))],
        out_specs=pl.BlockSpec((1, S, D), lambda b: (b, 0, 0)),
        compiler_params=pltpu.CompilerParams(
            dimension_semantics=("parallel",),
            vmem_limit_bytes=_VMEM_LIMIT),
    )(qkv)


def _cross_attn_kernel(q_ref, kv_ref, o_ref, *, num_heads, dh, scale):
    D = num_heads * dh
    kv = kv_ref[0]                                     # [Sk, 2D] bf16
    _attn_heads(q_ref[0], kv[:, :D], kv[:, D:2 * D], o_ref,
                num_heads=num_heads, dh=dh, scale=scale, causal=False)


def cross_attention(q, kv, num_heads):
    """q: [B, Sq, D] bf16; kv: [B, Sk, 2D] (fused K/V, bf16) -> [B, Sq, D] bf16."""
    B, Sq, D = q.shape
    Sk = kv.shape[1]
    dh = D // num_heads
    kern = functools.partial(_cross_attn_kernel, num_heads=num_heads, dh=dh,
                             scale=1.0 / math.sqrt(dh))
    return pl.pallas_call(
        kern,
        out_shape=jax.ShapeDtypeStruct((B, Sq, D), jnp.bfloat16),
        grid=(B,),
        in_specs=[
            pl.BlockSpec((1, Sq, D), lambda b: (b, 0, 0)),
            pl.BlockSpec((1, Sk, 2 * D), lambda b: (b, 0, 0)),
        ],
        out_specs=pl.BlockSpec((1, Sq, D), lambda b: (b, 0, 0)),
        compiler_params=pltpu.CompilerParams(
            dimension_semantics=("parallel",),
            vmem_limit_bytes=_VMEM_LIMIT),
    )(q, kv)


# ------------------------------ model pieces -------------------------------

def positional_encoding_table(max_len, d_model):
    pos = jnp.arange(max_len, dtype=jnp.float32)[:, None]
    div = jnp.exp(jnp.arange(0, d_model, 2, dtype=jnp.float32)
                  * (-math.log(10000.0) / d_model))
    pe = jnp.zeros((max_len, d_model), jnp.float32)
    pe = pe.at[:, 0::2].set(jnp.sin(pos * div))
    pe = pe.at[:, 1::2].set(jnp.cos(pos * div))
    return pe


def encoder_layer(x, p, num_heads):
    B, S, D = x.shape
    x2d = x.reshape(-1, D)
    # fused QKV projection (bf16 out) -> self-attention -> fused wo+residual+LN
    qkv = linear(x2d, p["attn"]["wqkv"], p["attn"]["bqkv"],
                 out_dtype=jnp.bfloat16).reshape(B, S, 3 * D)
    attn = self_attention(qkv, num_heads, causal=False)
    h = linear_residual_ln(attn.reshape(-1, D), x2d,
                           p["attn"]["wo"], p["attn"]["bo"],
                           p["ln1_g"], p["ln1_b"])
    # fused FFN + residual + LN
    h = ffn_residual_ln(h, p["w1"], p["b1"], p["w2"], p["b2"],
                        p["ln2_g"], p["ln2_b"])
    return h.reshape(B, S, D)


def decoder_layer(x, enc, p, num_heads):
    B, St, D = x.shape
    Ss = enc.shape[1]
    # masked self-attention (causal mask generated in-kernel)
    qkv = linear(x.reshape(-1, D), p["self_attn"]["wqkv"], p["self_attn"]["bqkv"],
                 out_dtype=jnp.bfloat16).reshape(B, St, 3 * D)
    sa = self_attention(qkv, num_heads, causal=True)
    x = linear_residual_ln(sa.reshape(-1, D), x.reshape(-1, D),
                           p["self_attn"]["wo"], p["self_attn"]["bo"],
                           p["ln1_g"], p["ln1_b"]).reshape(B, St, D)
    # cross-attention (no mask): Q from decoder, fused K/V from encoder output
    q = linear(x.reshape(-1, D), p["cross_attn"]["wq"], p["cross_attn"]["bq"],
               out_dtype=jnp.bfloat16).reshape(B, St, D)
    kv = linear(enc.reshape(-1, D), p["cross_attn"]["wkv"], p["cross_attn"]["bkv"],
                out_dtype=jnp.bfloat16).reshape(B, Ss, 2 * D)
    ca = cross_attention(q, kv, num_heads)
    x = linear_residual_ln(ca.reshape(-1, D), x.reshape(-1, D),
                           p["cross_attn"]["wo"], p["cross_attn"]["bo"],
                           p["ln2_g"], p["ln2_b"])
    # fused FFN + residual + LN
    x = ffn_residual_ln(x, p["w1"], p["b1"], p["w2"], p["b2"],
                        p["ln3_g"], p["ln3_b"])
    return x.reshape(B, St, D)


def transformer_forward(params, src, tgt, num_heads, d_model):
    B, Ss = src.shape
    _, St = tgt.shape
    pe = params["pe"]

    # sqrt(d_model) scale is folded into the embedding tables at init; the
    # gather + positional-encoding add stay as cheap JAX glue.
    src_emb = jnp.take(params["src_emb"], src, axis=0) + pe[:Ss][None, :, :]
    tgt_emb = jnp.take(params["tgt_emb"], tgt, axis=0) + pe[:St][None, :, :]
    # TODO(synk): dropout (p=0.1) omitted -- forward reproduced in eval mode.

    x = src_emb
    for lp in params["encoder"]:
        x = encoder_layer(x, lp, num_heads)
    enc = x

    y = tgt_emb
    for lp in params["decoder"]:
        y = decoder_layer(y, enc, lp, num_heads)

    logits = linear(y.reshape(-1, d_model), params["out_w"], params["out_b"])
    return logits.reshape(B, St, -1)


# ----------------------------- parameter init ------------------------------

def init_params(key, src_vocab, tgt_vocab, d_model, num_layers, d_ff, max_len):
    keys = iter(jax.random.split(key, 4096))

    def xav(shape, dtype=jnp.bfloat16):
        # xavier_uniform, matching _init_weights for dim>1 params; weights are
        # stored bf16 so the kernels stream half the bytes from HBM.
        fan_in, fan_out = shape
        lim = math.sqrt(6.0 / (fan_in + fan_out))
        return jax.random.uniform(next(keys), shape, jnp.float32,
                                  -lim, lim).astype(dtype)

    def self_attn_params():
        # per-matrix xavier init (matches separate q/k/v Linear layers), then fuse
        return dict(
            wqkv=jnp.concatenate([xav((d_model, d_model)) for _ in range(3)], axis=1),
            bqkv=jnp.zeros((3 * d_model,), jnp.float32),
            wo=xav((d_model, d_model)), bo=jnp.zeros((d_model,), jnp.float32))

    def cross_attn_params():
        return dict(
            wq=xav((d_model, d_model)), bq=jnp.zeros((d_model,), jnp.float32),
            wkv=jnp.concatenate([xav((d_model, d_model)) for _ in range(2)], axis=1),
            bkv=jnp.zeros((2 * d_model,), jnp.float32),
            wo=xav((d_model, d_model)), bo=jnp.zeros((d_model,), jnp.float32))

    def enc_layer():
        return dict(
            attn=self_attn_params(),
            w1=xav((d_model, d_ff)), b1=jnp.zeros((d_ff,), jnp.float32),
            w2=xav((d_ff, d_model)), b2=jnp.zeros((d_model,), jnp.float32),
            ln1_g=jnp.ones((d_model,), jnp.float32), ln1_b=jnp.zeros((d_model,), jnp.float32),
            ln2_g=jnp.ones((d_model,), jnp.float32), ln2_b=jnp.zeros((d_model,), jnp.float32))

    def dec_layer():
        return dict(
            self_attn=self_attn_params(),
            cross_attn=cross_attn_params(),
            w1=xav((d_model, d_ff)), b1=jnp.zeros((d_ff,), jnp.float32),
            w2=xav((d_ff, d_model)), b2=jnp.zeros((d_model,), jnp.float32),
            ln1_g=jnp.ones((d_model,), jnp.float32), ln1_b=jnp.zeros((d_model,), jnp.float32),
            ln2_g=jnp.ones((d_model,), jnp.float32), ln2_b=jnp.zeros((d_model,), jnp.float32),
            ln3_g=jnp.ones((d_model,), jnp.float32), ln3_b=jnp.zeros((d_model,), jnp.float32))

    scale = math.sqrt(d_model)
    return dict(
        # embedding tables stay f32 (gather precision) with sqrt(d_model) folded in
        src_emb=xav((src_vocab, d_model), jnp.float32) * scale,
        tgt_emb=xav((tgt_vocab, d_model), jnp.float32) * scale,
        pe=positional_encoding_table(max_len, d_model),
        encoder=[enc_layer() for _ in range(num_layers)],
        decoder=[dec_layer() for _ in range(num_layers)],
        out_w=xav((d_model, tgt_vocab)),
        out_b=jnp.zeros((tgt_vocab,), jnp.float32))


# --------------------------------- driver ----------------------------------

if __name__ == "__main__":
    key = jax.random.PRNGKey(0)
    src_vocab, tgt_vocab = 32, 32
    d_model, num_layers, num_heads, d_ff, max_len = 32, 2, 4, 64, 64
    B, Ss, St = 2, 8, 8

    pk, sk, tk = jax.random.split(key, 3)
    params = init_params(pk, src_vocab, tgt_vocab, d_model, num_layers, d_ff, max_len)
    src = jax.random.randint(sk, (B, Ss), 0, src_vocab, dtype=jnp.int32)
    tgt = jax.random.randint(tk, (B, St), 0, tgt_vocab, dtype=jnp.int32)

    logits = transformer_forward(params, src, tgt, num_heads, d_model)
    jax.block_until_ready(logits)

    assert logits.shape == (B, St, tgt_vocab), logits.shape
    assert bool(jnp.all(jnp.isfinite(logits)))
    print("KERNEL_OK")
</pallas_src>

<mosaic_0001>
module attributes {stable_mosaic.version = 11 : i64} {
  func.func @_linear_kernel(%arg0: i32, %arg1: i32, %arg2: memref<16x32xf32, #tpu.memory_space<vmem>>, %arg3: memref<32x96xbf16, #tpu.memory_space<vmem>>, %arg4: memref<1x96xf32, #tpu.memory_space<vmem>>, %arg5: memref<16x96xbf16, #tpu.memory_space<vmem>>) attributes {dimension_semantics = [#tpu.dimension_semantics<parallel>, #tpu.dimension_semantics<parallel>], iteration_bounds = array<i64: 1, 1>, scalar_prefetch = 0 : i64, scratch_operands = 0 : i64, tpu.core_type = #tpu.core_type<tc>, window_params = [{transform_indices = @transform_0, window_bounds = array<i64: 16, 32>}, {transform_indices = @transform_1, window_bounds = array<i64: 32, 96>}, {transform_indices = @transform_2, window_bounds = array<i64: 1, 96>}, {transform_indices = @transform_3, window_bounds = array<i64: 16, 96>}]} {
    %c0 = arith.constant 0 : index
    %c0_0 = arith.constant 0 : index
    %0 = vector.load %arg2[%c0, %c0_0] : memref<16x32xf32, #tpu.memory_space<vmem>>, vector<16x32xf32>
    %1 = arith.truncf %0 : vector<16x32xf32> to vector<16x32xbf16>
    %c0_1 = arith.constant 0 : index
    %c0_2 = arith.constant 0 : index
    %2 = vector.load %arg3[%c0_1, %c0_2] : memref<32x96xbf16, #tpu.memory_space<vmem>>, vector<32x96xbf16>
    %cst = arith.constant dense<0.000000e+00> : vector<16x96xf32>
    %3 = tpu.matmul %1, %2, %cst {dimension_numbers = #tpu.dot_dimension_numbers<[1], [0], [0], [1], [0, 0, 1, 1], [], []>} : vector<16x32xbf16>, vector<32x96xbf16>, vector<16x96xf32> -> vector<16x96xf32>
    %c0_3 = arith.constant 0 : index
    %c0_4 = arith.constant 0 : index
    %4 = vector.load %arg4[%c0_3, %c0_4] : memref<1x96xf32, #tpu.memory_space<vmem>>, vector<1x96xf32>
    %5 = vector.broadcast %4 : vector<1x96xf32> to vector<16x96xf32>
    %6 = arith.addf %3, %5 : vector<16x96xf32>
    %7 = arith.truncf %6 : vector<16x96xf32> to vector<16x96xbf16>
    %c0_5 = arith.constant 0 : index
    %c0_6 = arith.constant 0 : index
    %8 = vector.load %arg5[%c0_5, %c0_6] : memref<16x96xbf16, #tpu.memory_space<vmem>>, vector<16x96xbf16>
    tpu.vector_store %arg5[%c0_5, %c0_6], %7 {strides = array<i32>} : memref<16x96xbf16, #tpu.memory_space<vmem>>, vector<16x96xbf16>,
    return
  }
  func.func @transform_0(%arg0: i32, %arg1: i32) -> (i32, i32) {
    %c0_i32 = arith.constant 0 : i32
    %c0_i32_0 = arith.constant 0 : i32
    return %arg0, %c0_i32 : i32, i32
  }
  func.func @transform_1(%arg0: i32, %arg1: i32) -> (i32, i32) {
    %c0_i32 = arith.constant 0 : i32
    %c0_i32_0 = arith.constant 0 : i32
    return %c0_i32, %arg1 : i32, i32
  }
  func.func @transform_2(%arg0: i32, %arg1: i32) -> (i32, i32) {
    %c0_i32 = arith.constant 0 : i32
    %c0_i32_0 = arith.constant 0 : i32
    return %c0_i32, %arg1 : i32, i32
  }
  func.func @transform_3(%arg0: i32, %arg1: i32) -> (i32, i32) {
    %c0_i32 = arith.constant 0 : i32
    return %arg0, %arg1 : i32, i32
  }
}

</mosaic_0001>

<bundles_post_ra>
// kernel: tpu_custom_call.1
= control target key start
LH: loop header
LB: loop body
LE: loop exit
PB: predicated region body
PF: predicated region fallthrough
CT: control target
= control target key end

     0   :  { %8 = vsyncpa [#allocation3], 0  ;;  %s256_s0 = inlined_call_operand.hbm [shape: f32[16,32], index: 0, kind: input, shape index: {}]   ;;  %s257_s1 = inlined_call_operand.hbm [shape: bf16[32,96], index: 1, kind: input, shape index: {}]   ;;  %s258_s2 = inlined_call_operand.vmem [shape: f32[1,96], index: 2, kind: input, shape index: {}]   ;;  %s259_s3 = inlined_call_operand.hbm [shape: bf16[16,96], index: 3, kind: output, shape index: {}]  }
   0x1   :  { %9 = vsyncpa [#allocation6], 0 }
   0x2   :  { %10 = vsyncpa [#allocation4], 0  ;;  %s15_s14 = sshll.u32 %s256_s0, 4  ;;  %s211_s15 = smov [#allocation2]   ;;  %s16_s14 = int_to_ptr.hbm [resolvable:$true] %s15_s14 }
   0x3   :  { %s17_s16 = sshll.u32 %s211_s15, 4  ;;  %s28_s19 = sshll.u32 %s257_s1, 4  ;;  %s18_s16 = int_to_ptr.vmem [resolvable:$true] %s17_s16  ;;  %s29_s19 = int_to_ptr.hbm [resolvable:$true] %s28_s19 }
   0x4   :  { %s212_s20 = smov 128   ;;  %s213_s21 = smov 8  }
   0x5   :  { %23 = dma.hbm_to_vmem [thread:$0]  %s16_s14, 256, %s18_s16, [#allocation3], %s212_s20, %s212_s20, %s213_s21  }
   0x6   :  { %s214_s22 = smov [#allocation5]   ;;  %s215_s24 = smov 64  }
   0x7   :  { %s30_s23 = sshll.u32 %s214_s22, 4  ;;  %s216_s25 = smov 4   ;;  %s31_s23 = int_to_ptr.vmem [resolvable:$true] %s30_s23 }
   0x8   :  { %36 = dma.hbm_to_vmem [thread:$0]  %s29_s19, 256, %s31_s23, [#allocation6], %s215_s24, %s215_s24, %s216_s25  }
   0x9   :  { %205 = dma.done.wait [#allocation3], 256  }
   0xa   :  { %206 = vsyncadd [#allocation3], 4294967040 }
   0xb   :  { %207 = dma.done.wait [#allocation6], 256  }
   0xc   :  { %208 = vsyncadd [#allocation6], 4294967040  ;;  %v124_v0 = vld [vmem:[#allocation5 + $0x8] sm:$0xff]  ;;  %v123_v1 = vld [vmem:[#allocation5] sm:$0xff]  ;;  %vm71_vm0 = vcmask 261120   ;;  %vm91_vm1 = vcmask 781312  }
   0xd   :  { %81 = vmatpush.bf16.msra.mxu0 %v124_v0  ;;  %v48_v2 = vld [vmem:[#allocation2] sm:$0xff]  ;;  %v49_v3 = vld [vmem:[#allocation2 + $0x8] sm:$0xff]  ;;  %s217_s26 = smov [#allocation7]   ;;  %s100_s30 = sshll.u32 %s259_s3, 4  ;;  %s101_s30 = int_to_ptr.hbm [resolvable:$true] %s100_s30 }
   0xe   :  { %v50_v4 = vpack.c.bf16 %v49_v3, %v48_v2  ;;  %v132_v5 = vld [vmem:[%s258_s2] ss:$0 sm:$0xff]  ;;  %s98_s27 = sshll.u32 %s217_s26, 4  ;;  %s99_s27 = int_to_ptr.vmem [resolvable:$true] %s98_s27 }
  0x11   :  { %82 = vmatpush.bf16.msra.mxu0 %v123_v1 }
  0x14   :  { %122 = vmatmul.msk.bf16.vlgmr.msra.gmra.mxu0 %vm71_vm0, %v50_v4 }
  0x91   :  { %v84_v6 = vpop.f32.mrf.mxu0 }
  0x92   :  { %v85_v7 = vadd.f32 %v132_v5, %v84_v6 }
  0x94   :  { %v89_v8 = vpack.c.bf16 %v85_v7, %v85_v7 }
  0x96   :  { %92 = vst.msk [vmem:[#allocation7] sm:$0xf] %vm91_vm1, %v89_v8 }
  0x99   :  { %v86_v9 = vpop.f32.mrf.mxu0 }
  0x9a   :  { %v87_v10 = vadd.f32 %v132_v5, %v86_v9 }
  0x9c   :  { %v90_v11 = vpack.c.bf16 %v87_v10, %v87_v10 }
  0x9e   :  { %93 = vst.msk [vmem:[#allocation7 + $0x4] sm:$0xf] %vm91_vm1, %v90_v11 }
  0x9f   :  { %106 = dma.vmem_to_hbm [thread:$0]  %s99_s27, 128, %s101_s30, [#allocation4], %s215_s24, %s215_s24, %s216_s25  }
  0xa0   :  { %209 = dma.done.wait [#allocation4], 128  }
  0xa1   :  { %210 = vsyncadd [#allocation4], 4294967168 }
  0xa2   :  { %111 = vsyncpa [#allocation3], 1 }
  0xa3   :  { %112 = vsyncpa [#allocation6], 1 }
  0xa4   :  { %113 = vsyncpa [#allocation4], 1 }

</bundles_post_ra>
